<compile_context>
chip_gen: v7x
topology: tpu7x:2x2x1
jax: 0.10.0
libtpu: 0.0.40
codegen_flags: <defaults>
</compile_context>

<pallas_src>
import jax
import jax.numpy as jnp
from jax.experimental import pallas as pl
from jax.experimental.pallas import tpu as pltpu


def _scale_kernel(scale_ref, x_ref, o_ref):
    # scale_ref: (1,) f32 in SMEM; x_ref / o_ref: (tr, lane) f32 in VMEM.
    o_ref[...] = x_ref[...] * scale_ref[0]


# Lane widths to try for the lane-dense flatten (all multiples of 128).
_LANE_CANDIDATES = (1024, 512, 256, 128)
# ~2 MiB per block buffer: large enough for ~85% of HBM roofline, small enough
# that double-buffered input+output (4x block) fits every generation's default
# scoped VMEM (v5e 16 MiB, v6e/v7x 32 MiB).
_TARGET_BLOCK_BYTES = 2 * 1024 * 1024


def scale_forward(x, scale):
    """out = x * scale (scalar), via a Pallas TPU kernel.

    x:     float array of arbitrary rank (e.g. NCHW detector feature map).
    scale: float array of shape (1,), the learnable scalar parameter.
    """
    orig_shape = x.shape
    n = x.size
    itemsize = x.dtype.itemsize

    # --- pick a lane-dense 2D slab layout ---------------------------------
    lane = None
    for cand in _LANE_CANDIDATES:
        if n % cand == 0:
            lane = cand
            break
    if lane is None:
        # Rare fallback for sizes not divisible by 128: keep the original
        # last dim as the lane dim (correct, just not lane-dense).
        lane = orig_shape[-1]

    rows = n // lane
    x2d = x.reshape(rows, lane)  # contiguous row-major reshape: free

    # --- pick a row tile giving ~_TARGET_BLOCK_BYTES per block -------------
    tr = max(_TARGET_BLOCK_BYTES // (lane * itemsize), 8)
    tr = (tr // 8) * 8           # multiple of 8 sublanes
    if tr >= rows:
        tr = rows                # single block covering the full row extent
    grid = (pl.cdiv(rows, tr),)  # ragged last block is masked by Pallas

    out2d = pl.pallas_call(
        _scale_kernel,
        out_shape=jax.ShapeDtypeStruct((rows, lane), x.dtype),
        grid_spec=pltpu.PrefetchScalarGridSpec(
            num_scalar_prefetch=0,
            grid=grid,
            in_specs=[
                pl.BlockSpec(memory_space=pltpu.SMEM),         # scale scalar
                pl.BlockSpec((tr, lane), lambda i: (i, 0)),    # input tile
            ],
            out_specs=pl.BlockSpec((tr, lane), lambda i: (i, 0)),
        ),
        compiler_params=pltpu.CompilerParams(
            dimension_semantics=("parallel",),  # megacore-friendly on v7x
        ),
    )(scale, x2d)

    return out2d.reshape(orig_shape)


if __name__ == "__main__":
    key = jax.random.PRNGKey(0)
    # NCHW input, small shape: batch=2, channels=4, spatial=16x16.
    x = jax.random.normal(key, (2, 4, 16, 16), dtype=jnp.float32)

    # Deterministic parameter init, matching Scale(init_value=1.0) but using a
    # non-trivial value so the multiply is actually exercised.
    init_value = 1.5
    scale_param = jnp.array([init_value], dtype=jnp.float32)

    out = scale_forward(x, scale_param)
    out = jax.block_until_ready(out)

    expected = x * scale_param[0]
    assert out.shape == x.shape and out.dtype == x.dtype
    assert jnp.allclose(out, expected, atol=0.0, rtol=0.0)

    print("KERNEL_OK")
</pallas_src>

<mosaic_0001>
module attributes {stable_mosaic.version = 11 : i64} {
  func.func @_scale_kernel(%arg0: i32, %arg1: memref<1xf32, #tpu.memory_space<smem>>, %arg2: memref<2x1024xf32, #tpu.memory_space<vmem>>, %arg3: memref<2x1024xf32, #tpu.memory_space<vmem>>) attributes {dimension_semantics = [#tpu.dimension_semantics<parallel>], iteration_bounds = array<i64: 1>, scalar_prefetch = 0 : i64, scratch_operands = 0 : i64, tpu.core_type = #tpu.core_type<tc>, window_params = [{transform_indices = @transform_0, window_bounds = array<i64: 1>}, {transform_indices = @transform_1, window_bounds = array<i64: 2, 1024>}, {transform_indices = @transform_2, window_bounds = array<i64: 2, 1024>}]} {
    %c0 = arith.constant 0 : index
    %c0_0 = arith.constant 0 : index
    %0 = vector.load %arg2[%c0, %c0_0] : memref<2x1024xf32, #tpu.memory_space<vmem>>, vector<2x1024xf32>
    %c0_1 = arith.constant 0 : index
    %1 = memref.load %arg1[%c0_1] : memref<1xf32, #tpu.memory_space<smem>>
    %2 = vector.broadcast %1 : f32 to vector<2x1024xf32>
    %3 = arith.mulf %0, %2 : vector<2x1024xf32>
    %c0_2 = arith.constant 0 : index
    %c0_3 = arith.constant 0 : index
    %4 = vector.load %arg3[%c0_2, %c0_3] : memref<2x1024xf32, #tpu.memory_space<vmem>>, vector<2x1024xf32>
    tpu.vector_store %arg3[%c0_2, %c0_3], %3 {strides = array<i32>} : memref<2x1024xf32, #tpu.memory_space<vmem>>, vector<2x1024xf32>,
    return
  }
  func.func @transform_0(%arg0: i32) -> i32 {
    %c0_i32 = arith.constant 0 : i32
    %c0_i32_0 = arith.constant 0 : i32
    return %c0_i32 : i32
  }
  func.func @transform_1(%arg0: i32) -> (i32, i32) {
    %c0_i32 = arith.constant 0 : i32
    %c0_i32_0 = arith.constant 0 : i32
    return %arg0, %c0_i32 : i32, i32
  }
  func.func @transform_2(%arg0: i32) -> (i32, i32) {
    %c0_i32 = arith.constant 0 : i32
    %c0_i32_0 = arith.constant 0 : i32
    return %arg0, %c0_i32 : i32, i32
  }
}

</mosaic_0001>

<bundles_post_ra>
// kernel: tpu_custom_call.1
= control target key start
LH: loop header
LB: loop body
LE: loop exit
PB: predicated region body
PF: predicated region fallthrough
CT: control target
= control target key end

     0   :  { %8 = vsyncpa [#allocation4], 0  ;;  %s142_s0 = inlined_call_operand.<no memory space> [shape: f32[1], index: 0, kind: input, shape index: {}]   ;;  %s143_s1 = inlined_call_operand.hbm [shape: f32[2,1024], index: 1, kind: input, shape index: {}]   ;;  %s144_s2 = inlined_call_operand.hbm [shape: f32[2,1024], index: 2, kind: output, shape index: {}]  }
   0x1   :  { %9 = vsyncpa [#allocation5], 0  ;;  %s98_s9 = smov [#allocation3]   ;;  %s50_s13 = scalar_lea.hbm %s143_s1, 256 }
   0x2   :  { %s18_s10 = sshll.u32 %s98_s9, 4  ;;  %p51_p0 = scmp.ne.s32.totalorder %s143_s1, %s50_s13  ;;  %s19_s10 = int_to_ptr.vmem [resolvable:$true] %s18_s10 }
   0x3   :  { %p54_p1 = scmp.lt.u32.totalorder %s50_s13, %s143_s1 }
   0x5   :  { %p56_p2 = pnand %p54_p1, %p51_p0 }
   0x7   :  { %59 = shalt.err (!%p56_p2)
}
   0x8   :  { %s60_s18 = scalar_lea.vmem %s19_s10, 256  ;;  %p65_p4 = scmp.lt.s32.totalorder %s19_s10, %s19_s10 }
   0x9   :  { %p61_p3 = scmp.ne.s32.totalorder %s19_s10, %s60_s18  ;;  %p66_p5 = scmp.lt.s32.totalorder %s60_s18, %s60_s18 }
   0xb   :  { %p67_p6 = por %p66_p5, %p65_p4 }
   0xd   :  { %p68_p7 = pnand %p67_p6, %p61_p3 }
   0xf   :  { %71 = shalt.err (!%p68_p7)
}
  0x10   :  { %21 = dma.hbm_to_vmem [thread:$0]  %s143_s1, 256, %s19_s10, [#allocation4]  }
  0x11   :  { %94 = dma.done.wait [#allocation4], 256  }
  0x12   :  { %95 = vsyncadd [#allocation4], 4294967040  ;;  %v28_v0 = vstv %s142_s0  ;;  %s99_s23 = smov [#allocation6]   ;;  %v25_v1 = vld [vmem:[#allocation3] sm:$0xff]  ;;  %v26_v2 = vld [vmem:[#allocation3 + $0x8] sm:$0xff] }
  0x13   :  { %s39_s24 = sshll.u32 %s99_s23, 4  ;;  %v29_v3 = vmul.f32 %v28_v0, %v25_v1  ;;  %v30_v4 = vmul.f32 %v28_v0, %v26_v2  ;;  %s40_s24 = int_to_ptr.vmem [resolvable:$true] %s39_s24 }
  0x14   :  { %s72_s25 = scalar_lea.vmem %s40_s24, 256  ;;  %p77_p9 = scmp.lt.s32.totalorder %s40_s24, %s40_s24 }
  0x15   :  { %31 = vst [vmem:[#allocation6] sm:$0xff] %v29_v3  ;;  %32 = vst [vmem:[#allocation6 + $0x8] sm:$0xff] %v30_v4  ;;  %p73_p8 = scmp.ne.s32.totalorder %s40_s24, %s72_s25  ;;  %p78_p10 = scmp.lt.s32.totalorder %s72_s25, %s72_s25 }
  0x17   :  { %p79_p11 = por %p78_p10, %p77_p9 }
  0x19   :  { %p80_p12 = pnand %p79_p11, %p73_p8 }
  0x1b   :  { %83 = shalt.err (!%p80_p12)
}
  0x1c   :  { %s84_s0 = scalar_lea.hbm %s144_s2, 256 }
  0x1d   :  { %p85_p13 = scmp.ne.s32.totalorder %s144_s2, %s84_s0  ;;  %p88_p0 = scmp.lt.u32.totalorder %s84_s0, %s144_s2 }
  0x1f   :  { %p90_p1 = pnand %p88_p0, %p85_p13 }
  0x21   :  { %93 = shalt.err (!%p90_p1)
}
  0x22   :  { %42 = dma.vmem_to_hbm [thread:$0]  %s40_s24, 256, %s144_s2, [#allocation5]  }
  0x23   :  { %96 = dma.done.wait [#allocation5], 256  }
  0x24   :  { %97 = vsyncadd [#allocation5], 4294967040 }
  0x25   :  { %46 = vsyncpa [#allocation4], 1 }
  0x26   :  { %47 = vsyncpa [#allocation5], 1 }

</bundles_post_ra>
